<compile_context>
chip_gen: v5e
topology: v5e:2x2
jax: 0.10.0
libtpu: 0.0.40
codegen_flags: <defaults>
</compile_context>

<pallas_src>
import math

import jax
import jax.numpy as jnp
from jax.experimental import pallas as pl
from jax.experimental.pallas import tpu as pltpu

MASK = -1.0


def _round_up(x, m):
    return ((x + m - 1) // m) * m


def _vmem_plan():
    """(padded-input-tile byte target, scoped VMEM limit) per TPU generation."""
    try:
        vmem_phys = pltpu.get_tpu_info().vmem_capacity_bytes
    except Exception:
        vmem_phys = None
    if vmem_phys is None:
        # Unknown chip: conservative — double-buffered inputs fit even v5e's
        # 16 MiB default scoped budget; limit raised modestly for headroom.
        return 4 << 20, 32 << 20
    if vmem_phys <= (72 << 20):
        # v7x-class (64 MiB per TensorCore): 6 MiB tiles (~2 us DMA at
        # 3.2 TB/s >> 0.35 us step overhead); stay well under the ceiling.
        return 6 << 20, 40 << 20
    # v5e / v6e (128 MiB physical): bigger tiles; raise the scoped limit past
    # the 16 / 32 MiB defaults.
    return 8 << 20, 48 << 20


# ---------------------------------------------------------------------------
# Kernels
# ---------------------------------------------------------------------------
def _mean_pool_rows_kernel(x_ref, out_ref):
    # Plain path: one logical (B*N) row per tile row, reduce the full lane axis.
    x = x_ref[...]                                         # (m_tile, L)
    valid = x != MASK                                      # exact compare (matches torch ref)
    lens = jnp.sum(valid.astype(jnp.float32), axis=-1)     # (m_tile,) f32 counts
    vals = jnp.where(valid, x, jnp.zeros_like(x))          # zero out MASK entries
    s = jnp.sum(vals, axis=-1, dtype=jnp.float32)          # (m_tile,) f32 row sums
    # NOTE: rows with zero valid entries divide by zero, same as the reference.
    out_ref[...] = (s * pl.reciprocal(lens, approx=False)).astype(out_ref.dtype)


def _mean_pool_seg_kernel(x_ref, seg_ref, out_ref):
    # Densified path: each tile row packs R logical rows of length L
    # (width = R*L, a multiple of 128). Per-segment sums and counts go through
    # a (width, R) block-diagonal ones matmul on the otherwise-idle MXU.
    x = x_ref[...]                                         # (m_tile, R*L)
    seg = seg_ref[...]                                     # (R*L, R) f32
    valid = x != MASK
    vals = jnp.where(valid, x, jnp.zeros_like(x)).astype(jnp.float32)
    cnt = valid.astype(jnp.float32)
    s = jnp.dot(vals, seg, preferred_element_type=jnp.float32)     # (m_tile, R)
    lens = jnp.dot(cnt, seg, preferred_element_type=jnp.float32)   # (m_tile, R)
    out_ref[...] = (s * pl.reciprocal(lens, approx=False)).astype(out_ref.dtype)


# ---------------------------------------------------------------------------
# Wrapper
# ---------------------------------------------------------------------------
def mean_pooling(sims, *, m_tile=None):
    assert sims.ndim == 3
    B, N, L = sims.shape
    M = B * N
    dtype = sims.dtype
    itemsize = jnp.dtype(dtype).itemsize
    tile_target_bytes, vmem_limit = _vmem_plan()

    # --- layout: densify small-L rows into lane-dense packed rows -----------
    R = 1
    if L < 128:
        r = 128 // math.gcd(L, 128)          # smallest R with (R*L) % 128 == 0
        if M % r == 0:
            R = r
    rows, width = M // R, R * L
    x = sims.reshape(rows, width)            # contiguous -> metadata-only reshape
    row_align = 8 if R > 1 else 128          # plain path keeps a lane-dense 1D output

    # --- tile sizing by padded bytes -----------------------------------------
    padded_row_bytes = _round_up(width, 128) * itemsize
    auto = m_tile is None
    if auto:
        m_tile = max(row_align,
                     (tile_target_bytes // padded_row_bytes) // row_align * row_align)
        # Keep >=2 (ideally >=4) grid steps when rows allow, so the "parallel"
        # axis can shard across v7x's two TensorCores.
        if rows >= 4 * row_align:
            m_tile = min(m_tile, _round_up(pl.cdiv(rows, 4), row_align))
        elif rows >= 2 * row_align:
            m_tile = min(m_tile, _round_up(pl.cdiv(rows, 2), row_align))
    else:
        m_tile = _round_up(m_tile, row_align)
    m_tile = max(row_align, min(m_tile, _round_up(rows, row_align)))
    assert m_tile % row_align == 0

    grid = (pl.cdiv(rows, m_tile),)
    cparams = pltpu.CompilerParams(
        dimension_semantics=("parallel",),
        vmem_limit_bytes=vmem_limit)
    cost = pl.CostEstimate(
        flops=4 * M * L,
        transcendentals=0,
        bytes_accessed=M * L * itemsize + M * itemsize)

    if R > 1:
        # Block-diagonal ones: seg[k, r] = 1.0 iff k // L == r.
        # Constant block index -> stays resident across grid steps (no re-DMA).
        seg = (jnp.arange(width, dtype=jnp.int32)[:, None] // L
               == jnp.arange(R, dtype=jnp.int32)[None, :]).astype(jnp.float32)
        out2 = pl.pallas_call(
            _mean_pool_seg_kernel,
            out_shape=jax.ShapeDtypeStruct((rows, R), dtype),
            grid=grid,
            in_specs=[pl.BlockSpec((m_tile, width), lambda i: (i, 0)),
                      pl.BlockSpec((width, R), lambda i: (0, 0))],
            out_specs=pl.BlockSpec((m_tile, R), lambda i: (i, 0)),
            compiler_params=cparams,
            cost_estimate=cost,
        )(x, seg)
        return out2.reshape(B, N)

    out1 = pl.pallas_call(
        _mean_pool_rows_kernel,
        out_shape=jax.ShapeDtypeStruct((rows,), dtype),
        grid=grid,
        in_specs=[pl.BlockSpec((m_tile, width), lambda i: (i, 0))],
        out_specs=pl.BlockSpec((m_tile,), lambda i: (i,)),
        compiler_params=cparams,
        cost_estimate=cost,
    )(x)
    return out1.reshape(B, N)


# ---------------------------------------------------------------------------
# Reference + test harness
# ---------------------------------------------------------------------------
def mean_pooling_ref(sims):
    valid = sims != MASK
    lens = jnp.sum(valid, axis=-1)
    vals = jnp.where(valid, sims, 0.0)
    return jnp.sum(vals, axis=-1) / lens


def _make_inputs(key, B, N, L):
    k_vals, k_mask = jax.random.split(key)
    sims = jax.random.uniform(k_vals, (B, N, L), dtype=jnp.float32)
    # ~30% padding marked with MASK (= -1); keep the first element of every row
    # valid to avoid divide-by-zero in the comparison against the reference.
    pad = jax.random.bernoulli(k_mask, p=0.3, shape=(B, N, L))
    pad = pad.at[:, :, 0].set(False)
    return jnp.where(pad, jnp.float32(MASK), sims)


if __name__ == "__main__":
    keys = jax.random.split(jax.random.PRNGKey(0), 4)
    cases = [
        (keys[0], 2, 8, 16),      # densified path (R=8), single grid step
        (keys[1], 4, 128, 64),    # densified path (R=2), multi-step grid (4 steps)
        (keys[2], 4, 128, 256),   # plain path (L >= 128), multi-step grid (4 steps)
        (keys[3], 3, 5, 48),      # plain fallback (M % R != 0), partial tile
    ]
    for key, B, N, L in cases:
        sims = _make_inputs(key, B, N, L)
        out = mean_pooling(sims)
        jax.block_until_ready(out)
        ref = mean_pooling_ref(sims)
        assert out.shape == (B, N)
        assert jnp.allclose(out, ref, atol=1e-5, rtol=1e-5), (B, N, L)
    print("KERNEL_OK")
</pallas_src>

<mosaic_0001>
module attributes {stable_mosaic.version = 11 : i64} {
  func.func @_mean_pool_seg_kernel(%arg0: i32, %arg1: memref<8x128xf32, #tpu.memory_space<vmem>>, %arg2: memref<128x8xf32, #tpu.memory_space<vmem>>, %arg3: memref<8x8xf32, #tpu.memory_space<vmem>>) attributes {dimension_semantics = [#tpu.dimension_semantics<parallel>], iteration_bounds = array<i64: 1>, scalar_prefetch = 0 : i64, scratch_operands = 0 : i64, tpu.core_type = #tpu.core_type<tc>, window_params = [{transform_indices = @transform_0, window_bounds = array<i64: 8, 128>}, {pipeline_mode = #tpu.pipeline_mode<synchronous>, transform_indices = @transform_1, window_bounds = array<i64: 128, 8>}, {transform_indices = @transform_2, window_bounds = array<i64: 8, 8>}]} {
    %c0 = arith.constant 0 : index
    %c0_0 = arith.constant 0 : index
    %0 = vector.load %arg1[%c0, %c0_0] : memref<8x128xf32, #tpu.memory_space<vmem>>, vector<8x128xf32>
    %c0_1 = arith.constant 0 : index
    %c0_2 = arith.constant 0 : index
    %1 = vector.load %arg2[%c0_1, %c0_2] : memref<128x8xf32, #tpu.memory_space<vmem>>, vector<128x8xf32>
    %cst = arith.constant -1.000000e+00 : f32
    %2 = vector.broadcast %cst : f32 to vector<8x128xf32>
    %3 = arith.cmpf one, %0, %2 : vector<8x128xf32>
    %cst_3 = arith.constant 0.000000e+00 : f32
    %4 = vector.broadcast %cst_3 : f32 to vector<8x128xf32>
    %5 = arith.select %3, %0, %4 : vector<8x128xi1>, vector<8x128xf32>
    %6 = arith.extui %3 : vector<8x128xi1> to vector<8x128xi32>
    %7 = arith.sitofp %6 : vector<8x128xi32> to vector<8x128xf32>
    %cst_4 = arith.constant dense<0.000000e+00> : vector<8x8xf32>
    %8 = tpu.matmul %5, %1, %cst_4 {dimension_numbers = #tpu.dot_dimension_numbers<[1], [0], [0], [1], [0, 0, 1, 1], [], []>} : vector<8x128xf32>, vector<128x8xf32>, vector<8x8xf32> -> vector<8x8xf32>
    %cst_5 = arith.constant dense<0.000000e+00> : vector<8x8xf32>
    %9 = tpu.matmul %7, %1, %cst_5 {dimension_numbers = #tpu.dot_dimension_numbers<[1], [0], [0], [1], [0, 0, 1, 1], [], []>} : vector<8x128xf32>, vector<128x8xf32>, vector<8x8xf32> -> vector<8x8xf32>
    %10 = tpu.reciprocal %9 : vector<8x8xf32> -> vector<8x8xf32>
    %11 = arith.mulf %8, %10 : vector<8x8xf32>
    %c0_6 = arith.constant 0 : index
    %c0_7 = arith.constant 0 : index
    %12 = vector.load %arg3[%c0_6, %c0_7] : memref<8x8xf32, #tpu.memory_space<vmem>>, vector<8x8xf32>
    tpu.vector_store %arg3[%c0_6, %c0_7], %11 {strides = array<i32>} : memref<8x8xf32, #tpu.memory_space<vmem>>, vector<8x8xf32>,
    return
  }
  func.func @transform_0(%arg0: i32) -> (i32, i32) {
    %c0_i32 = arith.constant 0 : i32
    %c0_i32_0 = arith.constant 0 : i32
    return %arg0, %c0_i32 : i32, i32
  }
  func.func @transform_1(%arg0: i32) -> (i32, i32) {
    %c0_i32 = arith.constant 0 : i32
    %c0_i32_0 = arith.constant 0 : i32
    %c0_i32_1 = arith.constant 0 : i32
    return %c0_i32, %c0_i32_0 : i32, i32
  }
  func.func @transform_2(%arg0: i32) -> (i32, i32) {
    %c0_i32 = arith.constant 0 : i32
    %c0_i32_0 = arith.constant 0 : i32
    return %arg0, %c0_i32 : i32, i32
  }
}

</mosaic_0001>

<bundles_post_ra>
// kernel: tpu_custom_call.1
= control target key start
LH: loop header
LB: loop body
LE: loop exit
PB: predicated region body
PF: predicated region fallthrough
CT: control target
= control target key end

     0   :  { %s216_s0 = inlined_call_operand.vmem [shape: f32[2,128], index: 0, kind: input, shape index: {}]   ;;  %s217_s1 = inlined_call_operand.vmem [shape: f32[128,8], index: 1, kind: input, shape index: {}]   ;;  %s218_s2 = inlined_call_operand.hbm [shape: f32[2,8], index: 2, kind: output, shape index: {}]  }
   0x1   :  { %v28_v0 = vld [vmem:[%s217_s1 + $0x78] sm:$0xff]  ;;  %v27_v1 = vld [vmem:[%s217_s1 + $0x70] sm:$0xff]  ;;  %v26_v2 = vld [vmem:[%s217_s1 + $0x68] sm:$0xff] }
   0x2   :  { %53 = vmatpush.msra.mxu1 %v28_v0  ;;  %33 = vmatpush.msra.mxu0 %v28_v0 }
   0x4   :  { %54 = vmatpush.msra.mxu1 %v27_v1 }
   0x5   :  { %7 = vsyncpa [#allocation3], 0  ;;  %34 = vmatpush.msra.mxu0 %v27_v1  ;;  %v25_v3 = vld [vmem:[%s217_s1 + $0x60] sm:$0xff]  ;;  %v24_v4 = vld [vmem:[%s217_s1 + $0x58] sm:$0xff]  ;;  %v143_v17 = vmov 1.0   ;;  %vm88_vm5 = vcmask 64512  }
   0x6   :  { %55 = vmatpush.msra.mxu1 %v26_v2  ;;  %v23_v5 = vld [vmem:[%s217_s1 + $0x50] sm:$0xff]  ;;  %v22_v6 = vld [vmem:[%s217_s1 + $0x48] sm:$0xff]  ;;  %v21_v7 = vld [vmem:[%s217_s1 + $0x40] sm:$0xff] }
   0x7   :  { %35 = vmatpush.msra.mxu0 %v26_v2  ;;  %v20_v8 = vld [vmem:[%s217_s1 + $0x38] sm:$0xff]  ;;  %v19_v9 = vld [vmem:[%s217_s1 + $0x30] sm:$0xff]  ;;  %v18_v10 = vld [vmem:[%s217_s1 + $0x28] sm:$0xff] }
   0x8   :  { %56 = vmatpush.msra.mxu1 %v25_v3  ;;  %v17_v11 = vld [vmem:[%s217_s1 + $0x20] sm:$0xff]  ;;  %v16_v12 = vld [vmem:[%s217_s1 + $0x18] sm:$0xff]  ;;  %v15_v13 = vld [vmem:[%s217_s1 + $0x10] sm:$0xff] }
   0x9   :  { %36 = vmatpush.msra.mxu0 %v25_v3  ;;  %v14_v14 = vld [vmem:[%s217_s1 + $0x8] sm:$0xff]  ;;  %v12_v15 = vld [vmem:[%s216_s0] sm:$0xff] }
   0xa   :  { %57 = vmatpush.msra.mxu1 %v24_v4  ;;  %v13_v16 = vld [vmem:[%s217_s1] sm:$0xff]  ;;  %vm29_vm0 = vcmp.ne.f32.partialorder %v12_v15, -1.0 }
   0xb   :  { %37 = vmatpush.msra.mxu0 %v24_v4 }
   0xc   :  { %58 = vmatpush.msra.mxu1 %v23_v5 }
   0xd   :  { %38 = vmatpush.msra.mxu0 %v23_v5 }
   0xe   :  { %59 = vmatpush.msra.mxu1 %v22_v6 }
   0xf   :  { %39 = vmatpush.msra.mxu0 %v22_v6 }
  0x10   :  { %60 = vmatpush.msra.mxu1 %v21_v7 }
  0x11   :  { %40 = vmatpush.msra.mxu0 %v21_v7 }
  0x12   :  { %61 = vmatpush.msra.mxu1 %v20_v8 }
  0x13   :  { %41 = vmatpush.msra.mxu0 %v20_v8 }
  0x14   :  { %62 = vmatpush.msra.mxu1 %v19_v9 }
  0x15   :  { %42 = vmatpush.msra.mxu0 %v19_v9 }
  0x16   :  { %63 = vmatpush.msra.mxu1 %v18_v10 }
  0x17   :  { %43 = vmatpush.msra.mxu0 %v18_v10 }
  0x18   :  { %64 = vmatpush.msra.mxu1 %v17_v11 }
  0x19   :  { %44 = vmatpush.msra.mxu0 %v17_v11 }
  0x1a   :  { %65 = vmatpush.msra.mxu1 %v16_v12 }
  0x1b   :  { %45 = vmatpush.msra.mxu0 %v16_v12 }
  0x1c   :  { %66 = vmatpush.msra.mxu1 %v15_v13 }
  0x1d   :  { %46 = vmatpush.msra.mxu0 %v15_v13 }
  0x1e   :  { %67 = vmatpush.msra.mxu1 %v14_v14 }
  0x1f   :  { %47 = vmatpush.msra.mxu0 %v14_v14 }
  0x20   :  { %68 = vmatpush.msra.mxu1 %v13_v16 }
  0x21   :  { %48 = vmatpush.msra.mxu0 %v13_v16  ;;  %110 = vmatmul.msk.f32.vlgmr.msra.gmra.mxu1 %vm29_vm0, %v143_v17 }
  0x22   :  { %109 = vmatmul.msk.f32.vlgmr.msra.gmra.mxu0 %vm29_vm0, %v12_v15 }
  0x9e   :  { %v70_v18 = vpop.f32.mrf.mxu1 }
  0x9f   :  { %115 = vrcp.f32 %v70_v18  ;;  %v84_v22 = vand.u32 2147483648, %v70_v18  ;;  %v82_v24 = vand.u32 2147483647, %v70_v18  ;;  %vm78_vm2 = vweird.f32 %v70_v18  ;;  %v50_v26 = vpop.f32.mrf.mxu0 }
  0xa1   :  { %v85_v27 = vor.u32 1.1754944e-38, %v84_v22  ;;  %vm83_vm4 = vcmp.eq.f32.partialorder %v82_v24, 8.507059e+37 }
  0xa5   :  { %v116_v19 = vpop.eup %115 }
  0xa6   :  { %v74_v20 = vmul.f32 %v116_v19, %v70_v18  ;;  %vm79_vm1 = vweird.f32 %v116_v19 }
  0xa7   :  { %vm80_vm3 = vmor %vm78_vm2, %vm79_vm1 }
  0xa8   :  { %v75_v21 = vsub.f32 1.0, %v74_v20 }
  0xaa   :  { %v76_v23 = vmul.f32 %v116_v19, %v75_v21 }
  0xac   :  { %v77_v25 = vadd.f32 %v116_v19, %v76_v23 }
  0xae   :  { %v81_v28 = vsel %vm80_vm3, %v116_v19, %v77_v25 }
  0xaf   :  { %v86_v29 = vsel %vm83_vm4, %v85_v27, %v81_v28 }
  0xb0   :  { %v87_v30 = vmul.f32 %v86_v29, %v50_v26 }
  0xb2   :  { %89 = vst.msk [vmem:[#allocation2] sm:$0xff] %vm88_vm5, %v87_v30 }
  0xb3   :  { %93 = vsyncadd [#allocation3], 96  ;;  %s96_s15 = sshll.u32 %s218_s2, 4  ;;  %s144_s16 = smov [#allocation2]   ;;  %s97_s15 = int_to_ptr.hbm [resolvable:$true] %s96_s15 }
  0xb4   :  { %s94_s17 = sshll.u32 %s144_s16, 4  ;;  %s145_s18 = smov 32   ;;  %s95_s17 = int_to_ptr.vmem [resolvable:$true] %s94_s17 }
  0xb5   :  { %s146_s19 = smov 2  }
  0xb6   :  { %102 = dma.vmem_to_hbm [thread:$0]  %s95_s17, 32, %s97_s15, [#allocation3], %s145_s18, %s145_s18, %s146_s19  }
  0xb7   :  { %141 = dma.done.wait [#allocation3], 128  }
  0xb8   :  { %142 = vsyncadd [#allocation3], 4294967168 }
  0xb9   :  { %107 = vsyncpa [#allocation3], 1 }

</bundles_post_ra>
